<compile_context>
chip_gen: v7x
topology: tpu7x:2x2x1
jax: 0.10.0
libtpu: 0.0.40
codegen_flags: <defaults>
</compile_context>

<pallas_src>
import functools

import jax
import jax.numpy as jnp
from jax.experimental import pallas as pl
from jax.experimental.pallas import tpu as pltpu

LANES = 128                           # vreg lane width
SUBLANES = 8                          # f32 sublanes per vreg
FOLD_ROWS = 32                        # 4 independent (8,128) accumulator vregs
TARGET_STEP_BYTES = 8 * 1024 * 1024   # combined HBM bytes per grid step (~8 MiB)
VMEM_LIMIT_BYTES = 40 * 1024 * 1024   # 2 inputs x 2 bufs x 4 MiB = 16 MiB + headroom


def _round_up(x, m):
    return ((x + m - 1) // m) * m


def _rmse_partial_kernel(yhat_ref, y_ref, part_ref, *, n_rows, block_rows, fold_rows):
    """Per-block partial sum of squared differences, folded to (fold_rows, 128)."""
    i = pl.program_id(0)
    last = pl.num_programs(0) - 1

    # Cast after the VMEM load (free — VPU has slack in an HBM-bound kernel).
    d = yhat_ref[...].astype(jnp.float32) - y_ref[...].astype(jnp.float32)
    sq = d * d

    # Hot path: every block except the last does zero masking work.
    @pl.when(i != last)
    def _():
        part_ref[...] = sq.reshape(-1, fold_rows, LANES).sum(axis=0)

    # Last block only: rows past the logical end of the (padded) input hold
    # garbage read out-of-bounds by the partial-block DMA — zero them with a
    # row-only mask.  Intra-row tail elements were already zero-filled by
    # jnp.pad in the wrapper.  The mask works on row counts (not element
    # counts), so there is no int32 overflow risk for huge inputs.
    @pl.when(i == last)
    def _():
        valid_rows = jnp.int32(n_rows) - i * jnp.int32(block_rows)
        row = jax.lax.broadcasted_iota(jnp.int32, sq.shape, 0)
        masked = jnp.where(row < valid_rows, sq, 0.0)
        part_ref[...] = masked.reshape(-1, fold_rows, LANES).sum(axis=0)


def rmse_loss(yhat, y, eps=1e-6):
    assert yhat.shape == y.shape, "RMSELoss expects equal shapes (MSELoss default)"
    n_elems = yhat.size

    # Flatten in native dtype.  Pad only to a multiple of one (8,128) vreg tile
    # (1024 elements) — zero-copy reshape in the common divisible case.
    flat_yhat = yhat.reshape(-1)
    flat_y = y.reshape(-1)

    tile_elems = SUBLANES * LANES  # 1024
    padded_len = pl.cdiv(n_elems, tile_elems) * tile_elems
    pad = padded_len - n_elems
    if pad:
        flat_yhat = jnp.pad(flat_yhat, (0, pad))
        flat_y = jnp.pad(flat_y, (0, pad))

    n_rows = padded_len // LANES  # multiple of 8

    # dtype-aware block sizing: hold per-step HBM traffic near TARGET_STEP_BYTES
    # (8192 rows for f32+f32, 16384 for bf16+bf16), rounded to the fold granule.
    bytes_per_row = (jnp.dtype(yhat.dtype).itemsize + jnp.dtype(y.dtype).itemsize) * LANES
    max_block_rows = max(FOLD_ROWS,
                         (TARGET_STEP_BYTES // bytes_per_row) // FOLD_ROWS * FOLD_ROWS)

    # Prefer >= 2 blocks on mid-sized inputs so dimension_semantics=("parallel",)
    # can shard the grid across both TensorCores on v7x.
    half_rows = _round_up(pl.cdiv(n_rows, 2), FOLD_ROWS)
    block_rows = min(max_block_rows, half_rows)
    if block_rows >= n_rows:
        block_rows = n_rows  # single block covering the whole (padded) input
    fold_rows = FOLD_ROWS if block_rows % FOLD_ROWS == 0 else SUBLANES
    num_blocks = pl.cdiv(n_rows, block_rows)

    yhat2d = flat_yhat.reshape(n_rows, LANES)
    y2d = flat_y.reshape(n_rows, LANES)

    kernel = functools.partial(
        _rmse_partial_kernel,
        n_rows=n_rows,
        block_rows=block_rows,
        fold_rows=fold_rows,
    )

    partials = pl.pallas_call(
        kernel,
        out_shape=jax.ShapeDtypeStruct((num_blocks * fold_rows, LANES), jnp.float32),
        grid_spec=pltpu.PrefetchScalarGridSpec(
            num_scalar_prefetch=0,
            grid=(num_blocks,),
            in_specs=[
                pl.BlockSpec((block_rows, LANES), lambda i: (i, 0)),
                pl.BlockSpec((block_rows, LANES), lambda i: (i, 0)),
            ],
            out_specs=pl.BlockSpec((fold_rows, LANES), lambda i: (i, 0)),
        ),
        compiler_params=pltpu.CompilerParams(
            dimension_semantics=("parallel",),   # independent partial sums per block
            vmem_limit_bytes=VMEM_LIMIT_BYTES,   # room for 4 MiB/input double-buffered blocks
        ),
    )(yhat2d, y2d)

    # Tiny epilogue: combine partial sums, mean, +eps, sqrt (scalar work).
    mse = jnp.sum(partials) / jnp.float32(n_elems)
    return jnp.sqrt(mse + jnp.float32(eps))


if __name__ == "__main__":
    key = jax.random.PRNGKey(0)
    k1, k2, k3, k4, k5, k6 = jax.random.split(key, 6)

    # NCHW regression-style inputs (PyTorch default dtype is float32).
    yhat = jax.random.normal(k1, (2, 4, 16, 16), dtype=jnp.float32)
    y = jax.random.normal(k2, (2, 4, 16, 16), dtype=jnp.float32)
    loss = jax.block_until_ready(rmse_loss(yhat, y))
    ref = jnp.sqrt(jnp.mean((yhat - y) ** 2) + 1e-6)
    assert jnp.allclose(loss, ref, rtol=1e-5, atol=1e-6), (loss, ref)

    # Ragged size + native bf16 inputs: exercises the in-kernel last-block
    # masking path and the native-dtype (no wrapper upcast) path.
    yhat_b = jax.random.normal(k3, (2, 3, 7, 5), dtype=jnp.bfloat16)
    y_b = jax.random.normal(k4, (2, 3, 7, 5), dtype=jnp.bfloat16)
    loss_b = jax.block_until_ready(rmse_loss(yhat_b, y_b))
    ref_b = jnp.sqrt(
        jnp.mean((yhat_b.astype(jnp.float32) - y_b.astype(jnp.float32)) ** 2) + 1e-6
    )
    assert jnp.allclose(loss_b, ref_b, rtol=1e-5, atol=1e-6), (loss_b, ref_b)

    # Multi-block case: exercises both the unmasked hot path and the gated
    # last-block path, plus the (32,128) multi-accumulator fold.
    yhat_m = jax.random.normal(k5, (2, 4, 128, 128), dtype=jnp.float32)
    y_m = jax.random.normal(k6, (2, 4, 128, 128), dtype=jnp.float32)
    loss_m = jax.block_until_ready(rmse_loss(yhat_m, y_m))
    ref_m = jnp.sqrt(jnp.mean((yhat_m - y_m) ** 2) + 1e-6)
    assert jnp.allclose(loss_m, ref_m, rtol=1e-5, atol=1e-6), (loss_m, ref_m)

    print("KERNEL_OK")
</pallas_src>

<mosaic_0001>
module attributes {stable_mosaic.version = 11 : i64} {
  func.func @_rmse_partial_kernel(%arg0: i32, %arg1: memref<16x128xf32, #tpu.memory_space<vmem>>, %arg2: memref<16x128xf32, #tpu.memory_space<vmem>>, %arg3: memref<8x128xf32, #tpu.memory_space<vmem>>) attributes {dimension_semantics = [#tpu.dimension_semantics<parallel>], iteration_bounds = array<i64: 1>, scalar_prefetch = 0 : i64, scratch_operands = 0 : i64, tpu.core_type = #tpu.core_type<tc>, window_params = [{transform_indices = @transform_0, window_bounds = array<i64: 16, 128>}, {transform_indices = @transform_1, window_bounds = array<i64: 16, 128>}, {transform_indices = @transform_2, window_bounds = array<i64: 8, 128>}]} {
    %c0 = arith.constant 0 : index
    %c0_0 = arith.constant 0 : index
    %0 = vector.load %arg1[%c0, %c0_0] : memref<16x128xf32, #tpu.memory_space<vmem>>, vector<16x128xf32>
    %c0_1 = arith.constant 0 : index
    %c0_2 = arith.constant 0 : index
    %1 = vector.load %arg2[%c0_1, %c0_2] : memref<16x128xf32, #tpu.memory_space<vmem>>, vector<16x128xf32>
    %2 = arith.subf %0, %1 : vector<16x128xf32>
    %3 = arith.mulf %2, %2 : vector<16x128xf32>
    %c0_i32 = arith.constant 0 : i32
    %4 = arith.cmpi ne, %arg0, %c0_i32 : i32
    %5 = arith.extui %4 : i1 to i32
    %c0_i32_3 = arith.constant 0 : i32
    %6 = arith.cmpi ne, %5, %c0_i32_3 : i32
    scf.if %6 {
      %10 = vector.shape_cast %3 : vector<16x128xf32> to vector<2x8x128xf32>
      %cst = arith.constant dense<0.000000e+00> : vector<8x128xf32>
      %11 = vector.multi_reduction <add>, %10, %cst [0] : vector<2x8x128xf32> to vector<8x128xf32>
      %c0_6 = arith.constant 0 : index
      %c0_7 = arith.constant 0 : index
      %12 = vector.load %arg3[%c0_6, %c0_7] : memref<8x128xf32, #tpu.memory_space<vmem>>, vector<8x128xf32>
      tpu.vector_store %arg3[%c0_6, %c0_7], %11 {strides = array<i32>} : memref<8x128xf32, #tpu.memory_space<vmem>>, vector<8x128xf32>,
    } else {
    }
    %c0_i32_4 = arith.constant 0 : i32
    %7 = arith.cmpi eq, %arg0, %c0_i32_4 : i32
    %8 = arith.extui %7 : i1 to i32
    %c0_i32_5 = arith.constant 0 : i32
    %9 = arith.cmpi ne, %8, %c0_i32_5 : i32
    scf.if %9 {
      %c16_i32 = arith.constant 16 : i32
      %10 = arith.muli %arg0, %c16_i32 : i32
      %c16_i32_6 = arith.constant 16 : i32
      %11 = arith.subi %c16_i32_6, %10 : i32
      %12 = tpu.iota {dimensions = array<i32: 0>} : vector<16x128xi32>
      %13 = vector.broadcast %11 : i32 to vector<16x128xi32>
      %14 = arith.cmpi slt, %12, %13 : vector<16x128xi32>
      %cst = arith.constant 0.000000e+00 : f32
      %15 = vector.broadcast %cst : f32 to vector<16x128xf32>
      %16 = arith.select %14, %3, %15 : vector<16x128xi1>, vector<16x128xf32>
      %17 = vector.shape_cast %16 : vector<16x128xf32> to vector<2x8x128xf32>
      %cst_7 = arith.constant dense<0.000000e+00> : vector<8x128xf32>
      %18 = vector.multi_reduction <add>, %17, %cst_7 [0] : vector<2x8x128xf32> to vector<8x128xf32>
      %c0_8 = arith.constant 0 : index
      %c0_9 = arith.constant 0 : index
      %19 = vector.load %arg3[%c0_8, %c0_9] : memref<8x128xf32, #tpu.memory_space<vmem>>, vector<8x128xf32>
      tpu.vector_store %arg3[%c0_8, %c0_9], %18 {strides = array<i32>} : memref<8x128xf32, #tpu.memory_space<vmem>>, vector<8x128xf32>,
    } else {
    }
    return
  }
  func.func @transform_0(%arg0: i32) -> (i32, i32) {
    %c0_i32 = arith.constant 0 : i32
    %c0_i32_0 = arith.constant 0 : i32
    return %arg0, %c0_i32 : i32, i32
  }
  func.func @transform_1(%arg0: i32) -> (i32, i32) {
    %c0_i32 = arith.constant 0 : i32
    %c0_i32_0 = arith.constant 0 : i32
    return %arg0, %c0_i32 : i32, i32
  }
  func.func @transform_2(%arg0: i32) -> (i32, i32) {
    %c0_i32 = arith.constant 0 : i32
    %c0_i32_0 = arith.constant 0 : i32
    return %arg0, %c0_i32 : i32, i32
  }
}

</mosaic_0001>

<bundles_post_ra>
// kernel: tpu_custom_call.1
= control target key start
LH: loop header
LB: loop body
LE: loop exit
PB: predicated region body
PF: predicated region fallthrough
CT: control target
= control target key end

     0   :  { %7 = vsyncpa [#allocation3], 0  ;;  %s219_s0 = inlined_call_operand.hbm [shape: f32[16,128], index: 0, kind: input, shape index: {}]   ;;  %s220_s1 = inlined_call_operand.hbm [shape: f32[16,128], index: 1, kind: input, shape index: {}]   ;;  %s221_s2 = inlined_call_operand.hbm [shape: f32[8,128], index: 2, kind: output, shape index: {}]  }
   0x1   :  { %8 = vsyncpa [#allocation6], 0 }
   0x2   :  { %9 = vsyncpa [#allocation4], 0  ;;  %s163_s9 = smov [#allocation2]   ;;  %s91_s13 = scalar_lea.hbm %s219_s0, 256 }
   0x3   :  { %s15_s10 = sshll.u32 %s163_s9, 4  ;;  %p92_p0 = scmp.ne.s32.totalorder %s219_s0, %s91_s13  ;;  %s16_s10 = int_to_ptr.vmem [resolvable:$true] %s15_s10 }
   0x4   :  { %p95_p1 = scmp.lt.u32.totalorder %s91_s13, %s219_s0 }
   0x6   :  { %p97_p2 = pnand %p95_p1, %p92_p0 }
   0x8   :  { %100 = shalt.err (!%p97_p2)
}
   0x9   :  { %s101_s18 = scalar_lea.vmem %s16_s10, 256  ;;  %p106_p4 = scmp.lt.s32.totalorder %s16_s10, %s16_s10 }
   0xa   :  { %p102_p3 = scmp.ne.s32.totalorder %s16_s10, %s101_s18  ;;  %p107_p5 = scmp.lt.s32.totalorder %s101_s18, %s101_s18 }
   0xc   :  { %p108_p6 = por %p107_p5, %p106_p4 }
   0xe   :  { %p109_p7 = pnand %p108_p6, %p102_p3 }
  0x10   :  { %112 = shalt.err (!%p109_p7)
}
  0x11   :  { %s164_s19 = smov 128   ;;  %s165_s20 = smov 8  }
  0x12   :  { %21 = dma.hbm_to_vmem [thread:$0]  %s219_s0, 256, %s16_s10, [#allocation3], %s164_s19, %s164_s19, %s165_s20  }
  0x13   :  { %s166_s23 = smov [#allocation5]   ;;  %s113_s27 = scalar_lea.hbm %s220_s1, 256 }
  0x14   :  { %s27_s24 = sshll.u32 %s166_s23, 4  ;;  %p114_p8 = scmp.ne.s32.totalorder %s220_s1, %s113_s27  ;;  %s28_s24 = int_to_ptr.vmem [resolvable:$true] %s27_s24 }
  0x15   :  { %p117_p9 = scmp.lt.u32.totalorder %s113_s27, %s220_s1 }
  0x17   :  { %p119_p10 = pnand %p117_p9, %p114_p8 }
  0x19   :  { %122 = shalt.err (!%p119_p10)
}
  0x1a   :  { %s123_s4 = scalar_lea.vmem %s28_s24, 256  ;;  %p128_p12 = scmp.lt.s32.totalorder %s28_s24, %s28_s24 }
  0x1b   :  { %p124_p11 = scmp.ne.s32.totalorder %s28_s24, %s123_s4  ;;  %p129_p13 = scmp.lt.s32.totalorder %s123_s4, %s123_s4 }
  0x1d   :  { %p130_p0 = por %p129_p13, %p128_p12 }
  0x1f   :  { %p131_p1 = pnand %p130_p0, %p124_p11 }
  0x21   :  { %134 = shalt.err (!%p131_p1)
}
  0x22   :  { %33 = dma.hbm_to_vmem [thread:$0]  %s220_s1, 256, %s28_s24, [#allocation6], %s164_s19, %s164_s19, %s165_s20  }
  0x23   :  { %157 = dma.done.wait [#allocation3], 256  }
  0x24   :  { %158 = vsyncadd [#allocation3], 4294967040 }
  0x25   :  { %159 = dma.done.wait [#allocation6], 256  }
  0x26   :  { %160 = vsyncadd [#allocation6], 4294967040  ;;  %v40_v0 = vld [vmem:[#allocation2] sm:$0xff]  ;;  %v41_v1 = vld [vmem:[#allocation2 + $0x8] sm:$0xff]  ;;  %s167_s6 = smov [#allocation7]  }
  0x27   :  { %v42_v2 = vld [vmem:[#allocation5] sm:$0xff]  ;;  %v43_v3 = vld [vmem:[#allocation5 + $0x8] sm:$0xff]  ;;  %s76_s7 = sshll.u32 %s167_s6, 4  ;;  %s77_s7 = int_to_ptr.vmem [resolvable:$true] %s76_s7 }
  0x28   :  { %v44_v4 = vsub.f32 %v40_v0, %v42_v2  ;;  %v45_v5 = vsub.f32 %v41_v1, %v43_v3  ;;  %s135_s8 = scalar_lea.vmem %s77_s7, 128  ;;  %p140_p3 = scmp.lt.s32.totalorder %s77_s7, %s77_s7 }
  0x29   :  { %p136_p2 = scmp.ne.s32.totalorder %s77_s7, %s135_s8  ;;  %p141_p4 = scmp.lt.s32.totalorder %s135_s8, %s135_s8 }
  0x2a   :  { %v46_v6 = vmul.f32 %v44_v4, %v44_v4  ;;  %v47_v7 = vmul.f32 %v45_v5, %v45_v5 }
  0x2b   :  { %p142_p5 = por %p141_p4, %p140_p3 }
  0x2c   :  { %v68_v8 = vadd.f32 %v47_v7, %v46_v6 }
  0x2d   :  { %p143_p6 = pnand %p142_p5, %p136_p2 }
  0x2e   :  { %69 = vst [vmem:[#allocation7] sm:$0xff] %v68_v8 }
  0x2f   :  { %146 = shalt.err (!%p143_p6)
}
  0x30   :  { %s147_s10 = scalar_lea.hbm %s221_s2, 128 }
  0x31   :  { %p148_p7 = scmp.ne.s32.totalorder %s221_s2, %s147_s10  ;;  %p151_p8 = scmp.lt.u32.totalorder %s147_s10, %s221_s2 }
  0x33   :  { %p153_p9 = pnand %p151_p8, %p148_p7 }
  0x35   :  { %156 = shalt.err (!%p153_p9)
}
  0x36   :  { %79 = dma.vmem_to_hbm [thread:$0]  %s77_s7, 128, %s221_s2, [#allocation4]  }
  0x37   :  { %161 = dma.done.wait [#allocation4], 128  }
  0x38   :  { %162 = vsyncadd [#allocation4], 4294967168 }
  0x39   :  { %83 = vsyncpa [#allocation3], 1 }
  0x3a   :  { %84 = vsyncpa [#allocation6], 1 }
  0x3b   :  { %85 = vsyncpa [#allocation4], 1 }

</bundles_post_ra>
